<compile_context>
chip_gen: v6e
topology: v6e:2x2x1
jax: 0.10.0
libtpu: 0.0.40
codegen_flags: <defaults>
</compile_context>

<pallas_src>
import functools

import jax
import jax.numpy as jnp
from jax.experimental import pallas as pl
from jax.experimental.pallas import tpu as pltpu

D_IN = 784          # per-branch input dim (module hard-codes 784 * 2)
D_HID = 256
D_OUT = 1


def _round_up(x, m):
    return (x + m - 1) // m * m


def fuse_predictor_kernel(e1_ref, e2_ref, w1a_ref, w1b_ref, b1_ref,
                          w2r_ref, b2_ref, out_ref):
    # fc1 as two MXU matmuls (no lane-axis concatenate). bf16 x bf16 -> f32 acc.
    h = jnp.dot(e1_ref[...], w1a_ref[...],
                preferred_element_type=jnp.float32)              # (TB, 256)
    h = h + jnp.dot(e2_ref[...], w1b_ref[...],
                    preferred_element_type=jnp.float32)
    h = h + b1_ref[...]                                          # (1, 256) bcast

    # swish(x) = x * sigmoid(x); exp -> EUP, approx reciprocal -> EUP.
    # (exp(-h) -> +inf for very negative h; 1/inf -> 0, so swish -> 0, no NaN.)
    sig = pl.reciprocal(1.0 + jnp.exp(-h), approx=True)
    h = h * sig

    # fc2 as a cross-lane reduction (avoids a 1-column MXU pass).
    out = jnp.sum(h * w2r_ref[...], axis=-1, keepdims=True) + b2_ref[...]
    out_ref[...] = out.astype(out_ref.dtype)                     # (TB, 1)


def pack_params(w1, b1, w2, b2, *, fc1_dtype=jnp.bfloat16):
    """One-time weight packing (outside the hot path).

    w1: (1568, 256) pre-transposed fc1 weight; b1: (256,) or (1,256)
    w2: (256, 1)    pre-transposed fc2 weight; b2: (1,)   or (1,1)
    """
    w1a = jnp.asarray(w1[:D_IN]).astype(fc1_dtype)        # multiplies e1
    w1b = jnp.asarray(w1[D_IN:]).astype(fc1_dtype)        # multiplies e2
    b1 = jnp.asarray(b1, jnp.float32).reshape(1, D_HID)
    w2r = jnp.asarray(w2, jnp.float32).reshape(D_HID, D_OUT).T  # (1, 256)
    b2 = jnp.asarray(b2, jnp.float32).reshape(1, D_OUT)
    return w1a, w1b, b1, w2r, b2


@functools.partial(jax.jit, static_argnames=("block_b",))
def fuse_predictor(e1, e2, w1a, w1b, b1, w2r, b2, block_b=2048):
    """e1, e2: (B, 784), ideally already bf16 from the producer.

    Returns (B, 1) float32.
    """
    B = e1.shape[0]

    # Cast at the pallas_call boundary (NOT in the kernel) so the HBM DMA is
    # half-width.  Best is to hand in bf16 directly from the producer.
    if e1.dtype != jnp.bfloat16:
        e1 = e1.astype(jnp.bfloat16)
    if e2.dtype != jnp.bfloat16:
        e2 = e2.astype(jnp.bfloat16)

    # Batch tile: multiple of 8, capped so the grid has >= 2 steps whenever
    # B > 8 (v7x has 2 TensorCores and the batch axis is "parallel").
    TB = max(8, min(block_b, _round_up(pl.cdiv(B, 2), 8)))
    grid = (pl.cdiv(B, TB),)          # no jnp.pad: tail block is masked

    bytes_accessed = (
        e1.size * e1.dtype.itemsize + e2.size * e2.dtype.itemsize
        + w1a.size * w1a.dtype.itemsize + w1b.size * w1b.dtype.itemsize
        + b1.size * 4 + w2r.size * 4 + b2.size * 4 + B * D_OUT * 4)
    cost = pl.CostEstimate(
        flops=2 * B * (2 * D_IN) * D_HID + 2 * B * D_HID,
        transcendentals=B * D_HID,
        bytes_accessed=bytes_accessed)

    out = pl.pallas_call(
        fuse_predictor_kernel,
        out_shape=jax.ShapeDtypeStruct((B, D_OUT), jnp.float32),
        grid=grid,
        in_specs=[
            pl.BlockSpec((TB, D_IN), lambda i: (i, 0)),       # e1 tile (bf16)
            pl.BlockSpec((TB, D_IN), lambda i: (i, 0)),       # e2 tile (bf16)
            pl.BlockSpec((D_IN, D_HID), lambda i: (0, 0)),    # w1[:784]  (resident)
            pl.BlockSpec((D_IN, D_HID), lambda i: (0, 0)),    # w1[784:]  (resident)
            pl.BlockSpec((1, D_HID), lambda i: (0, 0)),       # b1
            pl.BlockSpec((1, D_HID), lambda i: (0, 0)),       # w2 row
            pl.BlockSpec((1, D_OUT), lambda i: (0, 0)),       # b2
        ],
        out_specs=pl.BlockSpec((TB, D_OUT), lambda i: (i, 0)),
        compiler_params=pltpu.CompilerParams(
            dimension_semantics=("parallel",),
            vmem_limit_bytes=32 * 1024 * 1024),
        cost_estimate=cost,
    )(e1, e2, w1a, w1b, b1, w2r, b2)
    return out


def reference(e1, e2, w1, b1, w2, b2):
    h = jnp.concatenate([e1, e2], axis=1)
    h = h @ w1 + b1.reshape(1, -1)
    h = h * jax.nn.sigmoid(h)
    return h @ w2 + b2.reshape(1, -1)


if __name__ == "__main__":
    key = jax.random.PRNGKey(0)
    k_e1, k_e2, k_w1, k_b1, k_w2, k_b2 = jax.random.split(key, 6)

    # Small batch that is NOT a multiple of the tile: exercises the masked
    # tail block (no-pad path) and the >=2-step grid (TB=8, grid=(2,)).
    B = 12
    e1_f32 = jax.random.normal(k_e1, (B, D_IN), dtype=jnp.float32)
    e2_f32 = jax.random.normal(k_e2, (B, D_IN), dtype=jnp.float32)

    # Deterministic synthetic parameters (uniform ~ PyTorch Linear default
    # scale), stored pre-transposed as (in_features, out_features).
    lim1 = 1.0 / jnp.sqrt(2.0 * D_IN)
    lim2 = 1.0 / jnp.sqrt(float(D_HID))
    w1 = jax.random.uniform(k_w1, (2 * D_IN, D_HID), jnp.float32, -lim1, lim1)
    b1 = jax.random.uniform(k_b1, (D_HID,), jnp.float32, -lim1, lim1)
    w2 = jax.random.uniform(k_w2, (D_HID, D_OUT), jnp.float32, -lim2, lim2)
    b2 = jax.random.uniform(k_b2, (D_OUT,), jnp.float32, -lim2, lim2)

    params = pack_params(w1, b1, w2, b2)          # fc1 weights -> bf16

    # Producer-side cast: hand the kernel bf16 activations so the dominant
    # activation DMA is already half width (no in-kernel cast, no wrapper
    # convert in the hot path).
    e1_bf16 = e1_f32.astype(jnp.bfloat16)
    e2_bf16 = e2_f32.astype(jnp.bfloat16)

    out = fuse_predictor(e1_bf16, e2_bf16, *params)
    out = jax.block_until_ready(out)

    ref = reference(e1_f32, e2_f32, w1, b1, w2, b2)   # full-f32 module reference
    assert out.shape == (B, D_OUT), out.shape
    max_err = float(jnp.max(jnp.abs(out - ref)))
    # Tolerance covers bf16 activations/fc1 weights and the EUP approx
    # reciprocal in sigmoid (observed error ~1e-3 at these scales).
    assert jnp.allclose(out, ref, atol=3e-2, rtol=3e-2), (
        f"mismatch vs reference, max abs err={max_err}")

    print("KERNEL_OK")
</pallas_src>

<mosaic_0001>
module attributes {stable_mosaic.version = 11 : i64} {
  func.func @fuse_predictor_kernel(%arg0: i32, %arg1: memref<8x784xbf16, #tpu.memory_space<vmem>>, %arg2: memref<8x784xbf16, #tpu.memory_space<vmem>>, %arg3: memref<784x256xbf16, #tpu.memory_space<vmem>>, %arg4: memref<784x256xbf16, #tpu.memory_space<vmem>>, %arg5: memref<1x256xf32, #tpu.memory_space<vmem>>, %arg6: memref<1x256xf32, #tpu.memory_space<vmem>>, %arg7: memref<1x1xf32, #tpu.memory_space<vmem>>, %arg8: memref<8x1xf32, #tpu.memory_space<vmem>>) attributes {dimension_semantics = [#tpu.dimension_semantics<parallel>], iteration_bounds = array<i64: 2>, scalar_prefetch = 0 : i64, scratch_operands = 0 : i64, tpu.core_type = #tpu.core_type<tc>, window_params = [{transform_indices = @transform_0, window_bounds = array<i64: 8, 784>}, {transform_indices = @transform_1, window_bounds = array<i64: 8, 784>}, {pipeline_mode = #tpu.pipeline_mode<synchronous>, transform_indices = @transform_2, window_bounds = array<i64: 784, 256>}, {pipeline_mode = #tpu.pipeline_mode<synchronous>, transform_indices = @transform_3, window_bounds = array<i64: 784, 256>}, {pipeline_mode = #tpu.pipeline_mode<synchronous>, transform_indices = @transform_4, window_bounds = array<i64: 1, 256>}, {pipeline_mode = #tpu.pipeline_mode<synchronous>, transform_indices = @transform_5, window_bounds = array<i64: 1, 256>}, {pipeline_mode = #tpu.pipeline_mode<synchronous>, transform_indices = @transform_6, window_bounds = array<i64: 1, 1>}, {transform_indices = @transform_7, window_bounds = array<i64: 8, 1>}]} {
    %c0 = arith.constant 0 : index
    %c0_0 = arith.constant 0 : index
    %0 = vector.load %arg1[%c0, %c0_0] : memref<8x784xbf16, #tpu.memory_space<vmem>>, vector<8x784xbf16>
    %c0_1 = arith.constant 0 : index
    %c0_2 = arith.constant 0 : index
    %1 = vector.load %arg3[%c0_1, %c0_2] : memref<784x256xbf16, #tpu.memory_space<vmem>>, vector<784x256xbf16>
    %cst = arith.constant dense<0.000000e+00> : vector<8x256xf32>
    %2 = tpu.matmul %0, %1, %cst {dimension_numbers = #tpu.dot_dimension_numbers<[1], [0], [0], [1], [0, 0, 1, 1], [], []>} : vector<8x784xbf16>, vector<784x256xbf16>, vector<8x256xf32> -> vector<8x256xf32>
    %c0_3 = arith.constant 0 : index
    %c0_4 = arith.constant 0 : index
    %3 = vector.load %arg2[%c0_3, %c0_4] : memref<8x784xbf16, #tpu.memory_space<vmem>>, vector<8x784xbf16>
    %c0_5 = arith.constant 0 : index
    %c0_6 = arith.constant 0 : index
    %4 = vector.load %arg4[%c0_5, %c0_6] : memref<784x256xbf16, #tpu.memory_space<vmem>>, vector<784x256xbf16>
    %cst_7 = arith.constant dense<0.000000e+00> : vector<8x256xf32>
    %5 = tpu.matmul %3, %4, %cst_7 {dimension_numbers = #tpu.dot_dimension_numbers<[1], [0], [0], [1], [0, 0, 1, 1], [], []>} : vector<8x784xbf16>, vector<784x256xbf16>, vector<8x256xf32> -> vector<8x256xf32>
    %6 = arith.addf %2, %5 : vector<8x256xf32>
    %c0_8 = arith.constant 0 : index
    %c0_9 = arith.constant 0 : index
    %7 = vector.load %arg5[%c0_8, %c0_9] : memref<1x256xf32, #tpu.memory_space<vmem>>, vector<1x256xf32>
    %8 = vector.broadcast %7 : vector<1x256xf32> to vector<8x256xf32>
    %9 = arith.addf %6, %8 : vector<8x256xf32>
    %cst_10 = arith.constant 0.000000e+00 : f32
    %10 = vector.broadcast %cst_10 : f32 to vector<8x256xf32>
    %11 = arith.subf %10, %9 : vector<8x256xf32>
    %12 = math.exp %11 : vector<8x256xf32>
    %cst_11 = arith.constant 1.000000e+00 : f32
    %13 = vector.broadcast %cst_11 : f32 to vector<8x256xf32>
    %14 = arith.addf %13, %12 : vector<8x256xf32>
    %15 = tpu.reciprocal %14 {approx = true} : vector<8x256xf32> -> vector<8x256xf32>
    %16 = arith.mulf %9, %15 : vector<8x256xf32>
    %c0_12 = arith.constant 0 : index
    %c0_13 = arith.constant 0 : index
    %17 = vector.load %arg6[%c0_12, %c0_13] : memref<1x256xf32, #tpu.memory_space<vmem>>, vector<1x256xf32>
    %18 = vector.broadcast %17 : vector<1x256xf32> to vector<8x256xf32>
    %19 = arith.mulf %16, %18 : vector<8x256xf32>
    %cst_14 = arith.constant dense<0.000000e+00> : vector<8xf32>
    %20 = vector.multi_reduction <add>, %19, %cst_14 [1] : vector<8x256xf32> to vector<8xf32>
    %21 = vector.shape_cast %20 : vector<8xf32> to vector<8x1xf32>
    %c0_15 = arith.constant 0 : index
    %c0_16 = arith.constant 0 : index
    %22 = vector.load %arg7[%c0_15, %c0_16] : memref<1x1xf32, #tpu.memory_space<vmem>>, vector<1x1xf32>
    %23 = vector.broadcast %22 : vector<1x1xf32> to vector<8x1xf32>
    %24 = arith.addf %21, %23 : vector<8x1xf32>
    %c0_17 = arith.constant 0 : index
    %c0_18 = arith.constant 0 : index
    %25 = vector.load %arg8[%c0_17, %c0_18] : memref<8x1xf32, #tpu.memory_space<vmem>>, vector<8x1xf32>
    tpu.vector_store %arg8[%c0_17, %c0_18], %24 {strides = array<i32>} : memref<8x1xf32, #tpu.memory_space<vmem>>, vector<8x1xf32>,
    return
  }
  func.func @transform_0(%arg0: i32) -> (i32, i32) {
    %c0_i32 = arith.constant 0 : i32
    %c0_i32_0 = arith.constant 0 : i32
    return %arg0, %c0_i32 : i32, i32
  }
  func.func @transform_1(%arg0: i32) -> (i32, i32) {
    %c0_i32 = arith.constant 0 : i32
    %c0_i32_0 = arith.constant 0 : i32
    return %arg0, %c0_i32 : i32, i32
  }
  func.func @transform_2(%arg0: i32) -> (i32, i32) {
    %c0_i32 = arith.constant 0 : i32
    %c0_i32_0 = arith.constant 0 : i32
    %c0_i32_1 = arith.constant 0 : i32
    return %c0_i32, %c0_i32_0 : i32, i32
  }
  func.func @transform_3(%arg0: i32) -> (i32, i32) {
    %c0_i32 = arith.constant 0 : i32
    %c0_i32_0 = arith.constant 0 : i32
    %c0_i32_1 = arith.constant 0 : i32
    return %c0_i32, %c0_i32_0 : i32, i32
  }
  func.func @transform_4(%arg0: i32) -> (i32, i32) {
    %c0_i32 = arith.constant 0 : i32
    %c0_i32_0 = arith.constant 0 : i32
    %c0_i32_1 = arith.constant 0 : i32
    return %c0_i32, %c0_i32_0 : i32, i32
  }
  func.func @transform_5(%arg0: i32) -> (i32, i32) {
    %c0_i32 = arith.constant 0 : i32
    %c0_i32_0 = arith.constant 0 : i32
    %c0_i32_1 = arith.constant 0 : i32
    return %c0_i32, %c0_i32_0 : i32, i32
  }
  func.func @transform_6(%arg0: i32) -> (i32, i32) {
    %c0_i32 = arith.constant 0 : i32
    %c0_i32_0 = arith.constant 0 : i32
    %c0_i32_1 = arith.constant 0 : i32
    return %c0_i32, %c0_i32_0 : i32, i32
  }
  func.func @transform_7(%arg0: i32) -> (i32, i32) {
    %c0_i32 = arith.constant 0 : i32
    %c0_i32_0 = arith.constant 0 : i32
    return %arg0, %c0_i32 : i32, i32
  }
}

</mosaic_0001>

<bundles_post_ra>
// kernel: fuse_predictor.1
= control target key start
LH: loop header
LB: loop body
LE: loop exit
PB: predicated region body
PF: predicated region fallthrough
CT: control target
= control target key end

     0   :  { %s3136_s0 = inlined_call_operand.hbm [shape: bf16[12,784], index: 0, kind: input, shape index: {}]   ;;  %s3137_s1 = inlined_call_operand.hbm [shape: bf16[12,784], index: 1, kind: input, shape index: {}]   ;;  %s3138_s2 = inlined_call_operand.hbm [shape: bf16[784,256], index: 2, kind: input, shape index: {}]   ;;  %s3139_s3 = inlined_call_operand.hbm [shape: bf16[784,256], index: 3, kind: input, shape index: {}]   ;;  %s3140_s4 = inlined_call_operand.vmem [shape: f32[1,256], index: 4, kind: input, shape index: {}]   ;;  %s3141_s5 = inlined_call_operand.vmem [shape: f32[1,256], index: 5, kind: input, shape index: {}]   ;;  %s3142_s6 = inlined_call_operand.<no memory space> [shape: f32[1,1], index: 6, kind: input, shape index: {}]   ;;  %s3143_s7 = inlined_call_operand.vmem [shape: f32[12,1], index: 7, kind: output, shape index: {}]  }
   0x1   :  { %v12_v0 = vstv %s3142_s6 }
   0x2   :  { %13 = vst [vmem:[#allocation2] sm:$0x1] %v12_v0 }
   0x3   :  { %14 = vsyncpa [#allocation4], 0 }
   0x4   :  { %16 = vsyncpa [#allocation4 + $0x1], 0 }
   0x5   :  { %17 = vsyncpa [#allocation6], 0 }
   0x6   :  { %19 = vsyncpa [#allocation6 + $0x1], 0 }
   0x7   :  { %20 = vsyncpa [#allocation9], 0  ;;  %s2913_s26 = smov 0   ;;  %s2915_s27 = smov 0  }
   0x8   :  { %s2917_s28 = smov 0   ;;  %s2919_s29 = smov 0  }
   0x9 LB: > { %s2932_s6 = sadd.s32 4294967295, %s2861_s29   ;;  %p46_p0 = scmp.ne.s32.totalorder %s2853_s27, %s2849_s26  ;;  %s2861_s29 = sphi %s2919_s29, %s3161_s29   ;;  %s2857_s28 = sphi %s2917_s28, %s3160_s28   ;;  %s2853_s27 = sphi %s2915_s27, %s3159_s27   ;;  %s2849_s26 = sphi %s2913_s26, %s3158_s26  }
   0xa   : > { %p3144_p1 = scmp.eq.s32.totalorder %s2932_s6, 0  ;;  %p2093_p2 = scmp.ge.s32.totalorder %s2861_s29, 1 }
   0xb   : > { %p214_p3 = scmp.lt.s32.totalorder %s2861_s29, 3  ;;  %s2863_s9 = smov [#allocation7]  }
   0xc   : > { %p2940_p4 = por %p3144_p1, %p46_p0  ;;  %s226_s10 = sshll.u32 %s2863_s9, 4  ;;  %s227_s10 = int_to_ptr.vmem [resolvable:$true] %s226_s10 }
   0xd   : > { %p2944_p5 = pnand %p2093_p2, %p214_p3  ;;  %s2864_s12 = smov [#allocation8]  }
   0xe   : > { %s3147_s30 = scalar_select %p2940_p4, 1, 0 }
   0xf   : > { %s3148_s8 = scalar_select %p2944_p5, 1, 0 }
  0x10   : > { %p2335_p6 = pneg %p2944_p5  ;;  %s239_s13 = sshll.u32 %s2864_s12, 4  ;;  %s240_s13 = int_to_ptr.vmem [resolvable:$true] %s239_s13 }
  0x11   : > { %s2718_s14 = scalar_lea.vmem %s227_s10, 12544  ;;  %p2726_p12 = scmp.lt.s32.totalorder %s227_s10, %s227_s10 }
  0x12   : > { %p2952_p7 = pnand %p2335_p6, %p3144_p1  ;;  %p2719_p9 = scmp.ne.s32.totalorder %s227_s10, %s2718_s14 }
  0x13   : > { %p2727_p13 = scmp.lt.s32.totalorder %s2718_s14, %s2718_s14 }
  0x14   : > { %p2709_p8 = pneg %p2952_p7 }
  0x15   : > { %p2728_p0 = por %p2727_p13, %p2726_p12 }
  0x16   : > { %p2721_p10 = pnand %p2719_p9, %p2709_p8 }
  0x18   : > { %p2722_p11 = pneg %p2721_p10 }
  0x1a   : > { %p2729_p2 = pnand %p2728_p0, %p2722_p11 }
  0x1c   : > { %2732 = shalt.err (!%p2729_p2)
}
  0x1d   : > { %s2865_s15 = smov 128   ;;  %s2866_s16 = smov 8  }
  0x1e   : > { %2338 = dma.hbm_to_vmem [thread:$0]  (!%p2952_p7), %s3138_s2, 12544, %s227_s10, [#allocation6], %s2865_s15, %s2865_s15, %s2866_s16  }
  0x1f   : > { %s2744_s19 = scalar_lea.vmem %s240_s13, 12544  ;;  %p2752_p10 = scmp.lt.s32.totalorder %s240_s13, %s240_s13 }
  0x20   : > { %p2745_p3 = scmp.ne.s32.totalorder %s240_s13, %s2744_s19  ;;  %p2753_p1 = scmp.lt.s32.totalorder %s2744_s19, %s2744_s19 }
  0x22   : > { %p2747_p6 = pnand %p2745_p3, %p2709_p8  ;;  %p2754_p12 = por %p2753_p1, %p2752_p10 }
  0x24   : > { %p2748_p9 = pneg %p2747_p6 }
  0x26   : > { %p2755_p11 = pnand %p2754_p12, %p2748_p9 }
  0x28   : > { %2758 = shalt.err (!%p2755_p11)
}
  0x29   : > { %2341 = dma.hbm_to_vmem [thread:$0]  (!%p2952_p7), %s3139_s3, 12544, %s240_s13, [#allocation9], %s2865_s15, %s2865_s15, %s2866_s16  }
  0x2a   : > { %s2975_s22 = sadd.s32 1, %s2861_s29   ;;  %s33_s23 = sadd.s32 1, %s2857_s28 }
  0x2b   : > { %s30_s24 = ssub.s32 %s2861_s29, %s2975_s22  ;;  %p40_p1 = scmp.ne.s32.totalorder %s2857_s28, %s2853_s27 }
  0x2c   : > { %p31_p8 = scmp.eq.s32.totalorder %s30_s24, 0  ;;  %p41_p13 = scmp.eq.s32.totalorder %s2861_s29, 0 }
  0x2d   : > { %p2351_p0 = scmp.lt.s32.totalorder %s2861_s29, 2  ;;  %s262_s25 = sand.u32 1, %s2857_s28  }
  0x2e   : > { %s2986_s26 = scalar_select %p31_p8, %s2857_s28, %s33_s23  }
  0x2f   : > { %p42_p2 = por %p41_p13, %p40_p1  ;;  %s2988_s9 = smul.u32 28, %s262_s25 }
  0x30   : > { %s281_s10 = sand.u32 1, %s2861_s29   ;;  %s2319_s11 = smul.u32 448, %s2861_s29 }
  0x31   : > { %p2992_p3 = pnand %p2351_p0, %p42_p2  ;;  %s266_s16 = scalar_lea.vmem [#allocation3], %s2988_s9 }
  0x32   : > { %s3001_s15 = scalar_lea.hbm %s3136_s0, %s2319_s11  ;;  %s274_s17 = sshll.u32 %s266_s16, 4  ;;  %s275_s17 = int_to_ptr.vmem [resolvable:$true] %s274_s17 }
  0x33   : > { %s263_s18 = scalar_lea.sflag [#allocation4], %s262_s25  ;;  %s2759_s19 = scalar_lea.hbm %s3001_s15, 448 }
  0x34   : > { %p2760_p7 = scmp.ne.s32.totalorder %s3001_s15, %s2759_s19  ;;  %p2761_p6 = pneg %p2992_p3 }
  0x35   : > { %s2764_s23 = scalar_lea.hbm %s3136_s0, 896  ;;  %p2765_p12 = scmp.lt.s32.totalorder %s3001_s15, %s3136_s0 }
  0x36   : > { %p2762_p9 = pnand %p2761_p6, %p2760_p7  ;;  %p2766_p11 = scmp.lt.s32.totalorder %s2764_s23, %s2759_s19 }
  0x38   : > { %p2763_p10 = pneg %p2762_p9  ;;  %p2767_p1 = por %p2766_p11, %p2765_p12 }
  0x3a   : > { %p2768_p8 = pnand %p2767_p1, %p2763_p10 }
  0x3c   : > { %2771 = shalt.err (!%p2768_p8)
}
  0x3d   : > { %s2772_s25 = scalar_lea.vmem %s275_s17, 448  ;;  %s2867_s14 = smov [#allocation3]  }
  0x3e   : > { %p2773_p13 = scmp.ne.s32.totalorder %s275_s17, %s2772_s25  ;;  %s2777_s16 = sshll.u32 %s2867_s14, 4  ;;  %s2778_s16 = int_to_ptr.vmem [resolvable:$false] %s2777_s16 }
  0x3f   : > { %s2779_s20 = scalar_lea.vmem %s2778_s16, 896  ;;  %p2780_p7 = scmp.lt.s32.totalorder %s275_s17, %s2778_s16 }
  0x40   : > { %p2775_p0 = pnand %p2773_p13, %p2761_p6  ;;  %p2781_p9 = scmp.lt.s32.totalorder %s2779_s20, %s2772_s25 }
  0x42   : > { %p2776_p2 = pneg %p2775_p0  ;;  %p2782_p4 = por %p2781_p9, %p2780_p7 }
  0x44   : > { %p2783_p5 = pnand %p2782_p4, %p2776_p2 }
  0x46   : > { %2786 = shalt.err (!%p2783_p5)
}
  0x47   : > { %2345 = dma.hbm_to_vmem [thread:$0]  (!%p2992_p3), %s3001_s15, 448, %s275_s17, %s263_s18  }
  0x48   : > { %s3029_s23 = scalar_lea.hbm %s3137_s1, %s2319_s11  ;;  %s285_s24 = scalar_lea.vmem [#allocation5], %s2988_s9 }
  0x49   : > { %s293_s13 = sshll.u32 %s285_s24, 4  ;;  %s282_s25 = scalar_lea.sflag [#allocation6], %s281_s10  ;;  %s294_s13 = int_to_ptr.vmem [resolvable:$true] %s293_s13 }
  0x4a   : > { %s2787_s14 = scalar_lea.hbm %s3029_s23, 448  ;;  %s2792_s18 = scalar_lea.hbm %s3137_s1, 896 }
  0x4b   : > { %p2788_p4 = scmp.ne.s32.totalorder %s3029_s23, %s2787_s14  ;;  %p2793_p12 = scmp.lt.s32.totalorder %s3029_s23, %s3137_s1 }
  0x4c   : > { %p2794_p11 = scmp.lt.s32.totalorder %s2792_s18, %s2787_s14 }
  0x4d   : > { %p2790_p5 = pnand %p2788_p4, %p2761_p6 }
  0x4e   : > { %p2795_p1 = por %p2794_p11, %p2793_p12 }
  0x4f   : > { %p2791_p10 = pneg %p2790_p5 }
  0x51   : > { %p2796_p8 = pnand %p2795_p1, %p2791_p10 }
  0x53   : > { %2799 = shalt.err (!%p2796_p8)
}
  0x54   : > { %s2800_s29 = scalar_lea.vmem %s294_s13, 448  ;;  %s2868_s9 = smov [#allocation5]  }
  0x55   : > { %p2801_p13 = scmp.ne.s32.totalorder %s294_s13, %s2800_s29  ;;  %s2805_s10 = sshll.u32 %s2868_s9, 4  ;;  %s2806_s10 = int_to_ptr.vmem [resolvable:$false] %s2805_s10 }
  0x56   : > { %s2807_s20 = scalar_lea.vmem %s2806_s10, 896  ;;  %p2808_p7 = scmp.lt.s32.totalorder %s294_s13, %s2806_s10 }
  0x57   : > { %p2803_p0 = pnand %p2801_p13, %p2761_p6  ;;  %p2809_p9 = scmp.lt.s32.totalorder %s2807_s20, %s2800_s29 }
  0x59   : > { %p2804_p2 = pneg %p2803_p0  ;;  %p2810_p4 = por %p2809_p9, %p2808_p7 }
  0x5b   : > { %p2811_p5 = pnand %p2810_p4, %p2804_p2 }
  0x5d   : > { %2814 = shalt.err (!%p2811_p5)
}
  0x5e   : > { %2348 = dma.hbm_to_vmem [thread:$0]  (!%p2992_p3), %s3029_s23, 448, %s294_s13, %s282_s25  }
  0x5f   : > { %p3151_p10 = scmp.ne.s32.totalorder %s3148_s8, 0 }
  0x60   : > { %s304_s19 = sand.u32 (!%p3151_p10), 1, %s2853_s27   ;;  %p3152_p6 = scmp.ne.s32.totalorder (!%p3151_p10), %s3147_s30, 0 }
  0x61   : > { %302 = sbr.rel (%p3151_p10) target bundleno = 696 (0x2b8), region = 48  ;;  %s305_s24 = scalar_lea.sflag (!%p3151_p10), [#allocation4], %s304_s19 }
  0x62   : > { %s2322_s21 = smul.u32 (!%p3151_p10), 28, %s304_s19 }
  0x64   : > { %s3055_s14 = scalar_lea.vmem (!%p3151_p10), [#allocation3], %s2322_s21 }
  0x66   : > { %2832 = dma.done.wait (%p3152_p6), %s305_s24, 448  }
  0x67   : > { %2834 = vsyncadd (%p3152_p6), %s305_s24, 4294966848  ;;  %s313_s12 = sand.u32 1, %s2932_s6   ;;  %s3062_s23 = scalar_lea.vmem [#allocation5], %s2322_s21 }
  0x68   : > { %s314_s15 = scalar_lea.sflag [#allocation6], %s313_s12 }
  0x69   : > { %2836 = dma.done.wait (%p3152_p6), %s314_s15, 448  }
  0x6a   : > { %2838 = vsyncadd (%p3152_p6), %s314_s15, 4294966848  ;;  %p3153_p3 = scmp.eq.s32.totalorder %s2932_s6, 0 }
  0x6c   : > { %2840 = dma.done.wait (%p3153_p3), [#allocation6], 12544   ;;  %p3154_p12 = pmov %p3153_p3 }
  0x6d   : > { %p3155_p11 = pmov %p3153_p3 }
  0x6e   : > { %2842 = vsyncadd (%p3154_p12), [#allocation6], 4294954752 }
  0x6f   : > { %2844 = dma.done.wait (%p3155_p11), [#allocation9], 12544   ;;  %p3156_p1 = pmov %p3153_p3 }
  0x70   : > { %v2391_v1 = vld [vmem:[#allocation8 + $0x74] ss:$8 sps:$4 sm:$0xff]   ;;  %v2395_v3 = vld [vmem:[#allocation8 + $0x70] ss:$8 sps:$4 sm:$0xff]   ;;  %v2397_v5 = vld [vmem:[#allocation8 + $0x64] ss:$8 sps:$4 sm:$0xff]  }
  0x71   : > { %2846 = vsyncadd (%p3156_p1), [#allocation9], 4294954752  ;;  %v2393_v2 = vld [vmem:[#allocation8 + $0x174] ss:$8 sps:$4 sm:$0xff]   ;;  %1087 = vmatprep.subr.bf16.mxu0 %v2391_v1  ;;  %v2396_v4 = vld [vmem:[#allocation8 + $0x170] ss:$8 sps:$4 sm:$0xff]  }
  0x72   : > { %1128 = vmatprep.subr.bf16.mxu1 %v2393_v2  ;;  %1088 = vmatpush1.bf16.msra.mxu0 %v2395_v3  ;;  %v2399_v6 = vld [vmem:[#allocation8 + $0x164] ss:$8 sps:$4 sm:$0xff]   ;;  %v2401_v7 = vld [vmem:[#allocation8 + $0x60] ss:$8 sps:$4 sm:$0xff]   ;;  %v2403_v9 = vld [vmem:[#allocation8 + $0x54] ss:$8 sps:$4 sm:$0xff]  }
  0x73   : > { %1129 = vmatpush1.bf16.msra.mxu1 %v2396_v4  ;;  %1089 = vmatprep.subr.bf16.mxu0 %v2397_v5  ;;  %v2402_v8 = vld [vmem:[#allocation8 + $0x160] ss:$8 sps:$4 sm:$0xff]   ;;  %v2405_v10 = vld [vmem:[#allocation8 + $0x154] ss:$8 sps:$4 sm:$0xff]   ;;  %v2407_v11 = vld [vmem:[#allocation8 + $0x50] ss:$8 sps:$4 sm:$0xff]  }
  0x74   : > { %1130 = vmatprep.subr.bf16.mxu1 %v2399_v6  ;;  %v2408_v12 = vld [vmem:[#allocation8 + $0x150] ss:$8 sps:$4 sm:$0xff]   ;;  %v2409_v13 = vld [vmem:[#allocation8 + $0x44] ss:$8 sps:$4 sm:$0xff]   ;;  %v2413_v15 = vld [vmem:[#allocation8 + $0x40] ss:$8 sps:$4 sm:$0xff]  }
  0x75   : > { %v2411_v14 = vld [vmem:[#allocation8 + $0x144] ss:$8 sps:$4 sm:$0xff]   ;;  %v2414_v16 = vld [vmem:[#allocation8 + $0x140] ss:$8 sps:$4 sm:$0xff]   ;;  %v2415_v17 = vld [vmem:[#allocation8 + $0x34] ss:$8 sps:$4 sm:$0xff]  }
  0x76   : > { %1090 = vmatpush1.bf16.msra.mxu0 %v2401_v7  ;;  %v2417_v18 = vld [vmem:[#allocation8 + $0x134] ss:$8 sps:$4 sm:$0xff]   ;;  %v2419_v19 = vld [vmem:[#allocation8 + $0x30] ss:$8 sps:$4 sm:$0xff]   ;;  %v2421_v21 = vld [vmem:[#allocation8 + $0x24] ss:$8 sps:$4 sm:$0xff]  }
  0x77   : > { %1131 = vmatpush1.bf16.msra.mxu1 %v2402_v8  ;;  %1091 = vmatprep.subr.bf16.mxu0 %v2403_v9  ;;  %v2420_v20 = vld [vmem:[#allocation8 + $0x130] ss:$8 sps:$4 sm:$0xff]   ;;  %v2423_v22 = vld [vmem:[#allocation8 + $0x124] ss:$8 sps:$4 sm:$0xff]   ;;  %v2425_v23 = vld [vmem:[#allocation8 + $0x20] ss:$8 sps:$4 sm:$0xff]  }
  0x78   : > { %1132 = vmatprep.subr.bf16.mxu1 %v2405_v10  ;;  %v2426_v24 = vld [vmem:[#allocation8 + $0x120] ss:$8 sps:$4 sm:$0xff]   ;;  %v2427_v25 = vld [vmem:[#allocation8 + $0x14] ss:$8 sps:$4 sm:$0xff]   ;;  %v2431_v27 = vld [vmem:[#allocation8 + $0x10] ss:$8 sps:$4 sm:$0xff]  }
  0x79   : > { %v2429_v26 = vld [vmem:[#allocation8 + $0x114] ss:$8 sps:$4 sm:$0xff]   ;;  %v2432_v28 = vld [vmem:[#allocation8 + $0x110] ss:$8 sps:$4 sm:$0xff]   ;;  %v2433_v29 = vld [vmem:[#allocation8 + $0x4] ss:$8 sps:$4 sm:$0xff]  }
  0x7a   : > { %1092 = vmatpush1.bf16.msra.mxu0 %v2407_v11  ;;  %v2435_v30 = vld [vmem:[#allocation8 + $0x104] ss:$8 sps:$4 sm:$0xff]   ;;  %v2437_v31 = vld [vmem:[#allocation8] ss:$8 sps:$4 sm:$0xff]   ;;  %v2439_v33 = vld [vmem:[#allocation8 + $0xf4] ss:$8 sps:$4 sm:$0xff]  }
  0x7b   : > { %1133 = vmatpush1.bf16.msra.mxu1 %v2408_v12  ;;  %1093 = vmatprep.subr.bf16.mxu0 %v2409_v13  ;;  %v2438_v32 = vld [vmem:[#allocation8 + $0x100] ss:$8 sps:$4 sm:$0xff]   ;;  %v2441_v34 = vld [vmem:[#allocation8 + $0x1f4] ss:$8 sps:$4 sm:$0xff]   ;;  %v2443_v35 = vld [vmem:[#allocation8 + $0xf0] ss:$8 sps:$4 sm:$0xff]  }
  0x7c   : > { %1134 = vmatprep.subr.bf16.mxu1 %v2411_v14  ;;  %v2444_v36 = vld [vmem:[#allocation8 + $0x1f0] ss:$8 sps:$4 sm:$0xff]   ;;  %v2445_v37 = vld [vmem:[#allocation8 + $0xe4] ss:$8 sps:$4 sm:$0xff]   ;;  %v2449_v39 = vld [vmem:[#allocation8 + $0xe0] ss:$8 sps:$4 sm:$0xff]  }
  0x7d   : > { %v2447_v38 = vld [vmem:[#allocation8 + $0x1e4] ss:$8 sps:$4 sm:$0xff]   ;;  %v2450_v40 = vld [vmem:[#allocation8 + $0x1e0] ss:$8 sps:$4 sm:$0xff]   ;;  %v2451_v41 = vld [vmem:[#allocation8 + $0xd4] ss:$8 sps:$4 sm:$0xff]  }
  0x7e   : > { %1094 = vmatpush1.bf16.msra.mxu0 %v2413_v15  ;;  %v2453_v42 = vld [vmem:[#allocation8 + $0x1d4] ss:$8 sps:$4 sm:$0xff]   ;;  %v2455_v43 = vld [vmem:[#allocation8 + $0xd0] ss:$8 sps:$4 sm:$0xff]   ;;  %v2457_v45 = vld [vmem:[#allocation8 + $0xc4] ss:$8 sps:$4 sm:$0xff]  }
  0x7f   : > { %1135 = vmatpush1.bf16.msra.mxu1 %v2414_v16  ;;  %1095 = vmatprep.subr.bf16.mxu0 %v2415_v17  ;;  %v2456_v44 = vld [vmem:[#allocation8 + $0x1d0] ss:$8 sps:$4 sm:$0xff]   ;;  %v2459_v46 = vld [vmem:[#allocation8 + $0x1c4] ss:$8 sps:$4 sm:$0xff]   ;;  %v2461_v50 = vld [vmem:[#allocation8 + $0xc0] ss:$8 sps:$4 sm:$0xff]  }
  0x80   : > { %1136 = vmatprep.subr.bf16.mxu1 %v2417_v18  ;;  %v467_v47 = vld [vmem:[%s3062_s23] sm:$0xff]  ;;  %v468_v49 = vld [vmem:[%s3062_s23 + $0x8] sm:$0xff]  ;;  %v2869_v14 = vmov 0   ;;  %v2506_v18 = vld [vmem:[%s3062_s23 + $0x18] ss:$0 sps:$4 sm:$0xff]   ;;  %vm1083_vm0 = vcmask 130048  }
  0x81   : > { %v2104_v48 = vcombine.high %v467_v47, %v467_v47  ;;  %v2462_v51 = vld [vmem:[#allocation8 + $0x1c0] ss:$8 sps:$4 sm:$0xff]   ;;  %v2106_v52 = vcombine.high %v468_v49, %v468_v49  ;;  %v2463_v53 = vld [vmem:[#allocation8 + $0xb4] ss:$8 sps:$4 sm:$0xff]   ;;  %v2467_v55 = vld [vmem:[#allocation8 + $0xb0] ss:$8 sps:$4 sm:$0xff]   ;;  %v2103_v7 = vcombine.low %v467_v47, %v467_v47  ;;  %v2105_v8 = vcombine.low %v468_v49, %v468_v49 }
  0x82   : > { %1096 = vmatpush1.bf16.msra.mxu0 %v2419_v19  ;;  %v2465_v54 = vld [vmem:[#allocation8 + $0x1b4] ss:$8 sps:$4 sm:$0xff]   ;;  %v2468_v56 = vld [vmem:[#allocation8 + $0x1b0] ss:$8 sps:$4 sm:$0xff]   ;;  %v2469_v57 = vld [vmem:[#allocation8 + $0xa4] ss:$8 sps:$4 sm:$0xff]  }
  0x83   : > { %1137 = vmatpush1.bf16.msra.mxu1 %v2420_v20  ;;  %1097 = vmatprep.subr.bf16.mxu0 %v2421_v21  ;;  %v2471_v58 = vld [vmem:[#allocation8 + $0x1a4] ss:$8 sps:$4 sm:$0xff]   ;;  %v2473_v59 = vld [vmem:[#allocation8 + $0xa0] ss:$8 sps:$4 sm:$0xff]   ;;  %v2475_v61 = vld [vmem:[#allocation8 + $0x94] ss:$8 sps:$4 sm:$0xff]  }
  0x84   : > { %1138 = vmatprep.subr.bf16.mxu1 %v2423_v22  ;;  %1119 = vmatprep.mubr.bf16.mxu0 %v2104_v48  ;;  %v2474_v60 = vld [vmem:[#allocation8 + $0x1a0] ss:$8 sps:$4 sm:$0xff]   ;;  %v2477_v62 = vld [vmem:[#allocation8 + $0x194] ss:$8 sps:$4 sm:$0xff]   ;;  %v2479_v63 = vld [vmem:[#allocation8 + $0x90] ss:$8 sps:$4 sm:$0xff]  }
  0x85   : > { %1160 = vmatprep.mubr.bf16.mxu1 %v2106_v52  ;;  %v2480_v0 = vld [vmem:[#allocation8 + $0x190] ss:$8 sps:$4 sm:$0xff]   ;;  %v2481_v1 = vld [vmem:[#allocation8 + $0x84] ss:$8 sps:$4 sm:$0xff]   ;;  %v2485_v3 = vld [vmem:[#allocation8 + $0x80] ss:$8 sps:$4 sm:$0xff]  }
  0x86   : > { %1098 = vmatpush1.bf16.msra.mxu0 %v2425_v23  ;;  %v2483_v2 = vld [vmem:[#allocation8 + $0x184] ss:$8 sps:$4 sm:$0xff]   ;;  %v2486_v4 = vld [vmem:[#allocation8 + $0x180] ss:$8 sps:$4 sm:$0xff]   ;;  %v2493_v5 = vld [vmem:[#allocation8 + $0x274] ss:$8 sps:$4 sm:$0xff]  }
  0x87   : > { %1139 = vmatpush1.bf16.msra.mxu1 %v2426_v24  ;;  %1099 = vmatprep.subr.bf16.mxu0 %v2427_v25  ;;  %v2496_v6 = vld [vmem:[#allocation8 + $0x304] ss:$8 sps:$4 sm:$0xff]   ;;  %v2491_v9 = vld [vmem:[#allocation8 + $0x270] ss:$8 sps:$4 sm:$0xff]   ;;  %v2494_v10 = vld [vmem:[#allocation8 + $0x300] ss:$8 sps:$4 sm:$0xff]  }
  0x88   : > { %1140 = vmatprep.subr.bf16.mxu1 %v2429_v26  ;;  %v2499_v11 = vld [vmem:[#allocation8 + $0x264] ss:$8 sps:$4 sm:$0xff]   ;;  %v2497_v13 = vld [vmem:[#allocation8 + $0x260] ss:$8 sps:$4 sm:$0xff]   ;;  %v2505_v15 = vld [vmem:[#allocation8 + $0x254] ss:$8 sps:$4 sm:$0xff]  }
  0x89   : > { %v2502_v12 = vld [vmem:[#allocation7 + $0x74] ss:$8 sps:$4 sm:$0xff]   ;;  %v2500_v16 = vld [vmem:[#allocation7 + $0x70] ss:$8 sps:$4 sm:$0xff]   ;;  %v2503_v17 = vld [vmem:[#allocation8 + $0x250] ss:$8 sps:$4 sm:$0xff]  }
  0x8a   : > { %1100 = vmatpush1.bf16.msra.mxu0 %v2431_v27  ;;  %v2509_v19 = vld [vmem:[#allocation7 + $0x64] ss:$8 sps:$4 sm:$0xff]   ;;  %v2512_v20 = vld [vmem:[#allocation8 + $0x244] ss:$8 sps:$4 sm:$0xff]   ;;  %v2507_v21 = vld [vmem:[#allocation7 + $0x60] ss:$8 sps:$4 sm:$0xff]  }
  0x8b   : > { %1141 = vmatpush1.bf16.msra.mxu1 %v2432_v28  ;;  %1101 = vmatprep.subr.bf16.mxu0 %v2433_v29  ;;  %v2510_v22 = vld [vmem:[#allocation8 + $0x240] ss:$8 sps:$4 sm:$0xff]   ;;  %v2515_v23 = vld [vmem:[#allocation7 + $0x54] ss:$8 sps:$4 sm:$0xff]   ;;  %v2518_v24 = vld [vmem:[#allocation8 + $0x234] ss:$8 sps:$4 sm:$0xff]  }
  0x8c   : > { %1142 = vmatprep.subr.bf16.mxu1 %v2435_v30  ;;  %v2513_v25 = vld [vmem:[#allocation7 + $0x50] ss:$8 sps:$4 sm:$0xff]   ;;  %v2516_v26 = vld [vmem:[#allocation8 + $0x230] ss:$8 sps:$4 sm:$0xff]   ;;  %v2521_v27 = vld [vmem:[#allocation7 + $0x44] ss:$8 sps:$4 sm:$0xff]  }
  0x8d   : > { %v2524_v28 = vld [vmem:[#allocation8 + $0x224] ss:$8 sps:$4 sm:$0xff]   ;;  %v2519_v29 = vld [vmem:[#allocation7 + $0x40] ss:$8 sps:$4 sm:$0xff]   ;;  %v2522_v30 = vld [vmem:[#allocation8 + $0x220] ss:$8 sps:$4 sm:$0xff]  }
  0x8e   : > { %1102 = vmatpush1.bf16.msra.mxu0 %v2437_v31  ;;  %v2527_v31 = vld [vmem:[#allocation7 + $0x34] ss:$8 sps:$4 sm:$0xff]   ;;  %v2545_v47 = vld [vmem:[#allocation7 + $0x4] ss:$8 sps:$4 sm:$0xff]   ;;  %v2543_v49 = vld [vmem:[#allocation7] ss:$8 sps:$4 sm:$0xff]  }
  0x8f   : > { %1143 = vmatpush1.bf16.msra.mxu1 %v2438_v32  ;;  %1103 = vmatprep.subr.bf16.mxu0 %v2439_v33  ;;  %v2530_v32 = vld [vmem:[#allocation8 + $0x214] ss:$8 sps:$4 sm:$0xff]   ;;  %v3082_v33 = vld [vmem:[%s3062_s23 + $0x10] sm:$0xff]  ;;  %p360_p8 = scmp.lt.s32.totalorder %s2932_s6, 1  ;;  %vm1983_vm1 = vcmask 7168  }
  0x90   : > { %1144 = vmatprep.subr.bf16.mxu1 %v2441_v34  ;;  %v2108_v34 = vcombine.high %v3082_v33, %v3082_v33  ;;  %v2548_v48 = vld [vmem:[#allocation8 + $0x2e4] ss:$8 sps:$4 sm:$0xff]   ;;  %v2554_v52 = vld [vmem:[#allocation8 + $0x2d4] ss:$8 sps:$4 sm:$0xff]  }
  0x91   : > { %s3163_s6 = smov (!%p360_p8, %s2932_s6), 1 }
  0x92   : > { %1104 = vmatpush2.bf16.msra.mxu0 %v2443_v35  ;;  %v2525_v35 = vld [vmem:[#allocation7 + $0x30] ss:$8 sps:$4 sm:$0xff]   ;;  %s2102_s17 = sshll.u32 %s3163_s6, 3 }
  0x93   : > { %1145 = vmatpush2.bf16.msra.mxu1 %v2444_v36  ;;  %1105 = vmatprep.subr.bf16.mxu0 %v2445_v37  ;;  %v2528_v36 = vld [vmem:[#allocation8 + $0x210] ss:$8 sps:$4 sm:$0xff]   ;;  %v2533_v37 = vld [vmem:[#allocation7 + $0x24] ss:$8 sps:$4 sm:$0xff]   ;;  %s363_s16 = scalar_lea.vmem %s3143_s7, %s2102_s17 }
  0x94   : > { %1146 = vmatprep.subr.bf16.mxu1 %v2447_v38  ;;  %v2536_v38 = vld [vmem:[#allocation8 + $0x204] ss:$8 sps:$4 sm:$0xff]  }
  0x96   : > { %1106 = vmatpush2.bf16.msra.mxu0 %v2449_v39  ;;  %v3087_v39 = vld [vmem:[%s3055_s14] sm:$0xff] }
  0x97   : > { %1147 = vmatpush2.bf16.msra.mxu1 %v2450_v40  ;;  %1107 = vmatprep.subr.bf16.mxu0 %v2451_v41  ;;  %v2531_v40 = vld [vmem:[#allocation7 + $0x20] ss:$8 sps:$4 sm:$0xff]   ;;  %v2534_v41 = vld [vmem:[#allocation8 + $0x200] ss:$8 sps:$4 sm:$0xff]  }
  0x98   : > { %1148 = vmatprep.subr.bf16.mxu1 %v2453_v42  ;;  %v2210_v42 = vcombine.high %v3087_v39, %v3087_v39 }
  0x9a   : > { %1108 = vmatpush2.bf16.msra.mxu0 %v2455_v43  ;;  %v2539_v43 = vld [vmem:[#allocation7 + $0x14] ss:$8 sps:$4 sm:$0xff]  }
  0x9b   : > { %1149 = vmatpush2.bf16.msra.mxu1 %v2456_v44  ;;  %1109 = vmatprep.subr.bf16.mxu0 %v2457_v45  ;;  %v2542_v44 = vld [vmem:[#allocation8 + $0x2f4] ss:$8 sps:$4 sm:$0xff]   ;;  %v2537_v45 = vld [vmem:[#allocation7 + $0x10] ss:$8 sps:$4 sm:$0xff]  }
  0x9c   : > { %1150 = vmatprep.subr.bf16.mxu1 %v2459_v46  ;;  %v2540_v46 = vld [vmem:[#allocation8 + $0x2f0] ss:$8 sps:$4 sm:$0xff]  }
  0x9e   : > { %1110 = vmatpush2.bf16.msra.mxu0 %v2461_v50  ;;  %v2546_v50 = vld [vmem:[#allocation8 + $0x2e0] ss:$8 sps:$4 sm:$0xff]  }
  0x9f   : > { %1151 = vmatpush2.bf16.msra.mxu1 %v2462_v51  ;;  %1111 = vmatprep.subr.bf16.mxu0 %v2463_v53  ;;  %v2551_v51 = vld [vmem:[#allocation7 + $0xf4] ss:$8 sps:$4 sm:$0xff]   ;;  %v2549_v53 = vld [vmem:[#allocation7 + $0xf0] ss:$8 sps:$4 sm:$0xff]  }
  0xa0   : > { %1152 = vmatprep.subr.bf16.mxu1 %v2465_v54  ;;  %v2552_v54 = vld [vmem:[#allocation8 + $0x2d0] ss:$8 sps:$4 sm:$0xff]  }
  0xa2   : > { %1112 = vmatpush2.bf16.msra.mxu0 %v2467_v55  ;;  %v2557_v55 = vld [vmem:[#allocation7 + $0xe4] ss:$8 sps:$4 sm:$0xff]  }
  0xa3   : > { %1153 = vmatpush2.bf16.msra.mxu1 %v2468_v56  ;;  %1113 = vmatprep.subr.bf16.mxu0 %v2469_v57  ;;  %v2560_v56 = vld [vmem:[#allocation8 + $0x2c4] ss:$8 sps:$4 sm:$0xff]   ;;  %v2555_v57 = vld [vmem:[#allocation7 + $0xe0] ss:$8 sps:$4 sm:$0xff]  }
  0xa4   : > { %1154 = vmatprep.subr.bf16.mxu1 %v2471_v58  ;;  %v2558_v58 = vld [vmem:[#allocation8 + $0x2c0] ss:$8 sps:$4 sm:$0xff]  }
  0xa6   : > { %1114 = vmatpush2.bf16.msra.mxu0 %v2473_v59  ;;  %v2563_v59 = vld [vmem:[#allocation7 + $0xd4] ss:$8 sps:$4 sm:$0xff]  }
  0xa7   : > { %1155 = vmatpush2.bf16.msra.mxu1 %v2474_v60  ;;  %1115 = vmatprep.subr.bf16.mxu0 %v2475_v61  ;;  %v2566_v60 = vld [vmem:[#allocation8 + $0x2b4] ss:$8 sps:$4 sm:$0xff]   ;;  %v2561_v61 = vld [vmem:[#allocation7 + $0xd0] ss:$8 sps:$4 sm:$0xff]  }
  0xa8   : > { %1156 = vmatprep.subr.bf16.mxu1 %v2477_v62  ;;  %v2564_v62 = vld [vmem:[#allocation8 + $0x2b0] ss:$8 sps:$4 sm:$0xff]  }
  0xaa   : > { %1116 = vmatpush2.bf16.msra.mxu0 %v2479_v63  ;;  %v2569_v63 = vld [vmem:[#allocation7 + $0xc4] ss:$8 sps:$4 sm:$0xff]  }
  0xab   : > { %1157 = vmatpush2.bf16.msra.mxu1 %v2480_v0  ;;  %1117 = vmatprep.subr.bf16.mxu0 %v2481_v1  ;;  %v2572_v0 = vld [vmem:[#allocation8 + $0x2a4] ss:$8 sps:$4 sm:$0xff]   ;;  %v2567_v1 = vld [vmem:[#allocation7 + $0xc0] ss:$8 sps:$4 sm:$0xff]  }
  0xac   : > { %1158 = vmatprep.subr.bf16.mxu1 %v2483_v2  ;;  %v2570_v2 = vld [vmem:[#allocation8 + $0x2a0] ss:$8 sps:$4 sm:$0xff]  }
  0xae   : > { %1118 = vmatpush2.bf16.msra.mxu0 %v2485_v3  ;;  %v2575_v3 = vld [vmem:[#allocation7 + $0xb4] ss:$8 sps:$4 sm:$0xff]  }
  0xaf   : > { %1159 = vmatpush2.bf16.msra.mxu1 %v2486_v4  ;;  %1169 = vmatprep.subr.bf16.mxu0 %v2493_v5  ;;  %v2578_v4 = vld [vmem:[#allocation8 + $0x294] ss:$8 sps:$4 sm:$0xff]   ;;  %v2573_v5 = vld [vmem:[#allocation7 + $0xb0] ss:$8 sps:$4 sm:$0xff]  }
  0xb0   : > { %1224 = vmatprep.subr.bf16.mxu1 %v2496_v6  ;;  %v2576_v6 = vld [vmem:[#allocation8 + $0x290] ss:$8 sps:$4 sm:$0xff]  }
  0xb1   : > { %1120 = vmatmul.mubr.bf16.vlgmr.msra.gmra.mxu0 %v2103_v7  ;;  %v2581_v7 = vld [vmem:[#allocation7 + $0xa4] ss:$8 sps:$4 sm:$0xff]  }
  0xb2   : > { %1161 = vmatmul.mubr.bf16.vlgmr.msra.gmra.mxu1 %v2105_v8  ;;  %1170 = vmatpush1.bf16.msra.mxu0 %v2491_v9  ;;  %v2584_v8 = vld [vmem:[#allocation8 + $0x284] ss:$8 sps:$4 sm:$0xff]   ;;  %v2579_v9 = vld [vmem:[#allocation7 + $0xa0] ss:$8 sps:$4 sm:$0xff]  }
  0xb3   : > { %1225 = vmatpush1.bf16.msra.mxu1 %v2494_v10  ;;  %1171 = vmatprep.subr.bf16.mxu0 %v2499_v11  ;;  %v2582_v10 = vld [vmem:[#allocation8 + $0x280] ss:$8 sps:$4 sm:$0xff]   ;;  %v2589_v11 = vld [vmem:[#allocation7 + $0x94] ss:$8 sps:$4 sm:$0xff]  }
  0xb4   : > { %1242 = vmatprep.mubr.bf16.mxu1 %v2869_v14  ;;  %1768 = vmatprep.subr.bf16.mxu1 %v2502_v12  ;;  %v2592_v12 = vld [vmem:[#allocation7 + $0x174] ss:$8 sps:$4 sm:$0xff]  }
  0xb5   : > { %1201 = vmatprep.mubr.bf16.mxu0 %v2108_v34  ;;  %v2615_v34 = vld [vmem:[#allocation7 + $0x254] ss:$8 sps:$4 sm:$0xff]  }
  0xb6   : > { %1172 = vmatpush1.bf16.msra.mxu0 %v2497_v13  ;;  %v2107_v13 = vcombine.low %v3082_v33, %v3082_v33  ;;  %v2610_v33 = vld [vmem:[#allocation7 + $0x140] ss:$8 sps:$4 sm:$0xff]  }
  0xb7   : > { %1173 = vmatprep.subr.bf16.mxu0 %v2505_v15  ;;  %v2587_v15 = vld [vmem:[#allocation7 + $0x90] ss:$8 sps:$4 sm:$0xff]  }
  0xba   : > { %2208 = vmatmul.mubr.msk.bf16.vlgmr.msra.gmra.mxu1 %vm1083_vm0, %v2506_v18  ;;  %1174 = vmatpush1.bf16.msra.mxu0 %v2503_v17  ;;  %v2595_v17 = vld [vmem:[#allocation7 + $0x84] ss:$8 sps:$4 sm:$0xff]   ;;  %v3094_v18 = vld [vmem:[%s3055_s14 + $0x8] sm:$0xff] }
  0xbb   : > { %1769 = vmatpush1.bf16.msra.mxu1 %v2500_v16  ;;  %1175 = vmatprep.subr.bf16.mxu0 %v2512_v20  ;;  %v2590_v16 = vld [vmem:[#allocation7 + $0x170] ss:$8 sps:$4 sm:$0xff]   ;;  %v2212_v20 = vcombine.high %v3094_v18, %v3094_v18 }
  0xbc   : > { %1770 = vmatprep.subr.bf16.mxu1 %v2509_v19  ;;  %1800 = vmatprep.mubr.bf16.mxu1 %v2210_v42  ;;  %v2598_v19 = vld [vmem:[#allocation7 + $0x164] ss:$8 sps:$4 sm:$0xff]   ;;  %v2627_v42 = vld [vmem:[#allocation7 + $0x234] ss:$8 sps:$4 sm:$0xff]  }
  0xbe   : > { %1176 = vmatpush1.bf16.msra.mxu0 %v2510_v22  ;;  %v2596_v22 = vld [vmem:[#allocation7 + $0x160] ss:$8 sps:$4 sm:$0xff]  }
  0xbf   : > { %1771 = vmatpush1.bf16.msra.mxu1 %v2507_v21  ;;  %1177 = vmatprep.subr.bf16.mxu0 %v2518_v24  ;;  %v2593_v21 = vld [vmem:[#allocation7 + $0x80] ss:$8 sps:$4 sm:$0xff]   ;;  %v2606_v24 = vld [vmem:[#allocation7 + $0x154] ss:$8 sps:$4 sm:$0xff]  }
  0xc0   : > { %1772 = vmatprep.subr.bf16.mxu1 %v2515_v23  ;;  %v2603_v23 = vld [vmem:[#allocation7 + $0x274] ss:$8 sps:$4 sm:$0xff]  }
  0xc2   : > { %1178 = vmatpush1.bf16.msra.mxu0 %v2516_v26  ;;  %v3101_v26 = vld [vmem:[%s3055_s14 + $0x10] sm:$0xff] }
  0xc3   : > { %1773 = vmatpush1.bf16.msra.mxu1 %v2513_v25  ;;  %1179 = vmatprep.subr.bf16.mxu0 %v2524_v28  ;;  %v2209_v25 = vcombine.low %v3087_v39, %v3087_v39  ;;  %v2604_v28 = vld [vmem:[#allocation7 + $0x150] ss:$8 sps:$4 sm:$0xff]   ;;  %v2624_v39 = vld [vmem:[#allocation7 + $0x124] ss:$8 sps:$4 sm:$0xff]  }
  0xc4   : > { %1774 = vmatprep.subr.bf16.mxu1 %v2521_v27  ;;  %v2601_v27 = vld [vmem:[#allocation7 + $0x270] ss:$8 sps:$4 sm:$0xff]  }
  0xc6   : > { %1180 = vmatpush1.bf16.msra.mxu0 %v2522_v30  ;;  %v2612_v30 = vld [vmem:[#allocation7 + $0x144] ss:$8 sps:$4 sm:$0xff]  }
  0xc7   : > { %1775 = vmatpush1.bf16.msra.mxu1 %v2519_v29  ;;  %1181 = vmatprep.subr.bf16.mxu0 %v2530_v32  ;;  %v2609_v29 = vld [vmem:[#allocation7 + $0x264] ss:$8 sps:$4 sm:$0xff]   ;;  %v2607_v32 = vld [vmem:[#allocation7 + $0x260] ss:$8 sps:$4 sm:$0xff]  }
  0xc8   : > { %1776 = vmatprep.subr.bf16.mxu1 %v2527_v31  ;;  %v2214_v31 = vcombine.high %v3101_v26, %v3101_v26 }
  0xca   : > { %1182 = vmatpush1.bf16.msra.mxu0 %v2528_v36  ;;  %v2613_v36 = vld [vmem:[#allocation7 + $0x250] ss:$8 sps:$4 sm:$0xff]  }
  0xcb   : > { %1777 = vmatpush1.bf16.msra.mxu1 %v2525_v35  ;;  %1183 = vmatprep.subr.bf16.mxu0 %v2536_v38  ;;  %v2618_v35 = vld [vmem:[#allocation7 + $0x134] ss:$8 sps:$4 sm:$0xff]   ;;  %v2621_v38 = vld [vmem:[#allocation7 + $0x244] ss:$8 sps:$4 sm:$0xff]  }
  0xcc   : > { %1778 = vmatprep.subr.bf16.mxu1 %v2533_v37  ;;  %v2616_v37 = vld [vmem:[#allocation7 + $0x130] ss:$8 sps:$4 sm:$0xff]  }
  0xce   : > { %1184 = vmatpush1.bf16.msra.mxu0 %v2534_v41  ;;  %v2622_v41 = vld [vmem:[#allocation7 + $0x120] ss:$8 sps:$4 sm:$0xff]  }
  0xcf   : > { %1779 = vmatpush1.bf16.msra.mxu1 %v2531_v40  ;;  %1185 = vmatprep.subr.bf16.mxu0 %v2542_v44  ;;  %v2619_v40 = vld [vmem:[#allocation7 + $0x240] ss:$8 sps:$4 sm:$0xff]   ;;  %v2625_v44 = vld [vmem:[#allocation7 + $0x230] ss:$8 sps:$4 sm:$0xff]  }
  0xd0   : > { %1780 = vmatprep.subr.bf16.mxu1 %v2539_v43  ;;  %v2630_v43 = vld [vmem:[#allocation7 + $0x114] ss:$8 sps:$4 sm:$0xff]  }
  0xd2   : > { %1186 = vmatpush2.bf16.msra.mxu0 %v2540_v46  ;;  %v2633_v46 = vld [vmem:[#allocation7 + $0x224] ss:$8 sps:$4 sm:$0xff]  }
  0xd3   : > { %1781 = vmatpush1.bf16.msra.mxu1 %v2537_v45  ;;  %1187 = vmatprep.subr.bf16.mxu0 %v2548_v48  ;;  %v2628_v45 = vld [vmem:[#allocation7 + $0x110] ss:$8 sps:$4 sm:$0xff]   ;;  %v2631_v48 = vld [vmem:[#allocation7 + $0x220] ss:$8 sps:$4 sm:$0xff]  }
  0xd4   : > { %1782 = vmatprep.subr.bf16.mxu1 %v2545_v47  ;;  %v2636_v47 = vld [vmem:[#allocation7 + $0x104] ss:$8 sps:$4 sm:$0xff]  }
  0xd6   : > { %1188 = vmatpush2.bf16.msra.mxu0 %v2546_v50  ;;  %v2639_v50 = vld [vmem:[#allocation7 + $0x214] ss:$8 sps:$4 sm:$0xff]  }
  0xd7   : > { %1783 = vmatpush1.bf16.msra.mxu1 %v2543_v49  ;;  %1189 = vmatprep.subr.bf16.mxu0 %v2554_v52  ;;  %v2634_v49 = vld [vmem:[#allocation7 + $0x100] ss:$8 sps:$4 sm:$0xff]   ;;  %v2637_v52 = vld [vmem:[#allocation7 + $0x210] ss:$8 sps:$4 sm:$0xff]  }
  0xd8   : > { %1784 = vmatprep.subr.bf16.mxu1 %v2551_v51  ;;  %v2642_v51 = vld [vmem:[#allocation7 + $0x1f4] ss:$8 sps:$4 sm:$0xff]  }
  0xda   : > { %1190 = vmatpush2.bf16.msra.mxu0 %v2552_v54  ;;  %v2645_v54 = vld [vmem:[#allocation7 + $0x204] ss:$8 sps:$4 sm:$0xff]  }
  0xdb   : > { %1785 = vmatpush2.bf16.msra.mxu1 %v2549_v53  ;;  %1191 = vmatprep.subr.bf16.mxu0 %v2560_v56  ;;  %v2640_v53 = vld [vmem:[#allocation7 + $0x1f0] ss:$8 sps:$4 sm:$0xff]   ;;  %v2643_v56 = vld [vmem:[#allocation7 + $0x200] ss:$8 sps:$4 sm:$0xff]  }
  0xdc   : > { %1786 = vmatprep.subr.bf16.mxu1 %v2557_v55  ;;  %v2648_v55 = vld [vmem:[#allocation7 + $0x1e4] ss:$8 sps:$4 sm:$0xff]  }
  0xde   : > { %1192 = vmatpush2.bf16.msra.mxu0 %v2558_v58  ;;  %v2651_v58 = vld [vmem:[#allocation7 + $0x2f4] ss:$8 sps:$4 sm:$0xff]  }
  0xdf   : > { %1787 = vmatpush2.bf16.msra.mxu1 %v2555_v57  ;;  %1193 = vmatprep.subr.bf16.mxu0 %v2566_v60  ;;  %v2646_v57 = vld [vmem:[#allocation7 + $0x1e0] ss:$8 sps:$4 sm:$0xff]   ;;  %v2649_v60 = vld [vmem:[#allocation7 + $0x2f0] ss:$8 sps:$4 sm:$0xff]  }
  0xe0   : > { %1788 = vmatprep.subr.bf16.mxu1 %v2563_v59  ;;  %v2654_v59 = vld [vmem:[#allocation7 + $0x1d4] ss:$8 sps:$4 sm:$0xff]  }
  0xe2   : > { %1194 = vmatpush2.bf16.msra.mxu0 %v2564_v62  ;;  %v2657_v62 = vld [vmem:[#allocation7 + $0x2e4] ss:$8 sps:$4 sm:$0xff]  }
  0xe3   : > { %1789 = vmatpush2.bf16.msra.mxu1 %v2561_v61  ;;  %1195 = vmatprep.subr.bf16.mxu0 %v2572_v0  ;;  %v2652_v61 = vld [vmem:[#allocation7 + $0x1d0] ss:$8 sps:$4 sm:$0xff]   ;;  %v2655_v0 = vld [vmem:[#allocation7 + $0x2e0] ss:$8 sps:$4 sm:$0xff]  }
  0xe4   : > { %1790 = vmatprep.subr.bf16.mxu1 %v2569_v63  ;;  %v2660_v63 = vld [vmem:[#allocation7 + $0x1c4] ss:$8 sps:$4 sm:$0xff]  }
  0xe6   : > { %1196 = vmatpush2.bf16.msra.mxu0 %v2570_v2  ;;  %v2663_v2 = vld [vmem:[#allocation7 + $0x2d4] ss:$8 sps:$4 sm:$0xff]  }
  0xe7   : > { %1791 = vmatpush2.bf16.msra.mxu1 %v2567_v1  ;;  %1197 = vmatprep.subr.bf16.mxu0 %v2578_v4  ;;  %v2658_v1 = vld [vmem:[#allocation7 + $0x1c0] ss:$8 sps:$4 sm:$0xff]   ;;  %v2661_v4 = vld [vmem:[#allocation7 + $0x2d0] ss:$8 sps:$4 sm:$0xff]  }
  0xe8   : > { %1792 = vmatprep.subr.bf16.mxu1 %v2575_v3  ;;  %v2666_v3 = vld [vmem:[#allocation7 + $0x1b4] ss:$8 sps:$4 sm:$0xff]  }
  0xea   : > { %1198 = vmatpush2.bf16.msra.mxu0 %v2576_v6  ;;  %v2669_v6 = vld [vmem:[#allocation7 + $0x2c4] ss:$8 sps:$4 sm:$0xff]  }
  0xeb   : > { %1793 = vmatpush2.bf16.msra.mxu1 %v2573_v5  ;;  %1199 = vmatprep.subr.bf16.mxu0 %v2584_v8  ;;  %v2664_v5 = vld [vmem:[#allocation7 + $0x1b0] ss:$8 sps:$4 sm:$0xff]   ;;  %v2667_v8 = vld [vmem:[#allocation7 + $0x2c0] ss:$8 sps:$4 sm:$0xff]  }
  0xec   : > { %1794 = vmatprep.subr.bf16.mxu1 %v2581_v7  ;;  %v2672_v7 = vld [vmem:[#allocation7 + $0x1a4] ss:$8 sps:$4 sm:$0xff]  }
  0xee   : > { %1200 = vmatpush2.bf16.msra.mxu0 %v2582_v10  ;;  %v2675_v10 = vld [vmem:[#allocation7 + $0x2b4] ss:$8 sps:$4 sm:$0xff]  }
  0xef   : > { %1795 = vmatpush2.bf16.msra.mxu1 %v2579_v9  ;;  %1809 = vmatprep.subr.bf16.mxu0 %v2592_v12  ;;  %v2670_v9 = vld [vmem:[#allocation7 + $0x1a0] ss:$8 sps:$4 sm:$0xff]   ;;  %v2673_v12 = vld [vmem:[#allocation7 + $0x2b0] ss:$8 sps:$4 sm:$0xff]  }
  0xf0   : > { %1796 = vmatprep.subr.bf16.mxu1 %v2589_v11  ;;  %v2678_v11 = vld [vmem:[#allocation7 + $0x194] ss:$8 sps:$4 sm:$0xff]  }
  0xf1   : > { %1202 = vmatmul.mubr.bf16.vlgmr.msra.gmra.mxu0 %v2107_v13  ;;  %v2676_v13 = vld [vmem:[#allocation7 + $0x190] ss:$8 sps:$4 sm:$0xff]  }
  0xf2   : > { %1810 = vmatpush1.bf16.msra.mxu0 %v2590_v16  ;;  %1841 = vmatprep.mubr.bf16.mxu0 %v2212_v20  ;;  %v2684_v16 = vld [vmem:[#allocation7 + $0x184] ss:$8 sps:$4 sm:$0xff]   ;;  %v2689_v20 = vld [vmem:[#allocation7 + $0x294] ss:$8 sps:$4 sm:$0xff]  }
  0xf3   : > { %1797 = vmatpush2.bf16.msra.mxu1 %v2587_v15  ;;  %1811 = vmatprep.subr.bf16.mxu0 %v2598_v19  ;;  %v2681_v15 = vld [vmem:[#allocation7 + $0x2a4] ss:$8 sps:$4 sm:$0xff]   ;;  %v2682_v19 = vld [vmem:[#allocation7 + $0x180] ss:$8 sps:$4 sm:$0xff]  }
  0xf4   : > { %1798 = vmatprep.subr.bf16.mxu1 %v2595_v17  ;;  %v2679_v17 = vld [vmem:[#allocation7 + $0x2a0] ss:$8 sps:$4 sm:$0xff]  }
  0xf6   : > { %1812 = vmatpush1.bf16.msra.mxu0 %v2596_v22  ;;  %v2211_v22 = vcombine.low %v3094_v18, %v3094_v18 }
  0xf7   : > { %1799 = vmatpush2.bf16.msra.mxu1 %v2593_v21  ;;  %1813 = vmatprep.subr.bf16.mxu0 %v2606_v24  ;;  %v2692_v21 = vld [vmem:[#allocation7 + $0x304] ss:$8 sps:$4 sm:$0xff]   ;;  %v2690_v24 = vld [vmem:[#allocation7 + $0x300] ss:$8 sps:$4 sm:$0xff]  }
  0xf8   : > { %1850 = vmatprep.subr.bf16.mxu1 %v2603_v23  ;;  %v2687_v23 = vld [vmem:[#allocation7 + $0x290] ss:$8 sps:$4 sm:$0xff]  }
  0xfa   : > { %1801 = vmatmul.mubr.bf16.vlgmr.msra.gmra.mxu1 %v2209_v25  ;;  %1814 = vmatpush1.bf16.msra.mxu0 %v2604_v28  ;;  %v2695_v25 = vld [vmem:[#allocation7 + $0x284] ss:$8 sps:$4 sm:$0xff]   ;;  %v2213_v28 = vcombine.low %v3101_v26, %v3101_v26 }
  0xfb   : > { %1851 = vmatpush1.bf16.msra.mxu1 %v2601_v27  ;;  %1815 = vmatprep.subr.bf16.mxu0 %v2612_v30  ;;  %v2693_v27 = vld [vmem:[#allocation7 + $0x280] ss:$8 sps:$4 sm:$0xff]  }
  0xfc   : > { %1852 = vmatprep.subr.bf16.mxu1 %v2609_v29  ;;  %1882 = vmatprep.mubr.bf16.mxu1 %v2214_v31  ;;  %v2698_v29 = vld [vmem:[%s3055_s14 + $0x18] ss:$0 sps:$4 sm:$0xff]  }
  0xfe   : > { %1816 = vmatpush1.bf16.msra.mxu0 %v2610_v33 }
  0xff   : > { %1853 = vmatpush1.bf16.msra.mxu1 %v2607_v32  ;;  %1817 = vmatprep.subr.bf16.mxu0 %v2618_v35 }
 0x100   : > { %1854 = vmatprep.subr.bf16.mxu1 %v2615_v34 }
 0x102   : > { %1818 = vmatpush1.bf16.msra.mxu0 %v2616_v37 }
 0x103   : > { %1855 = vmatpush1.bf16.msra.mxu1 %v2613_v36  ;;  %1819 = vmatprep.subr.bf16.mxu0 %v2624_v39 }
 0x104   : > { %1856 = vmatprep.subr.bf16.mxu1 %v2621_v38 }
 0x106   : > { %1820 = vmatpush1.bf16.msra.mxu0 %v2622_v41 }
 0x107   : > { %1857 = vmatpush1.bf16.msra.mxu1 %v2619_v40  ;;  %1821 = vmatprep.subr.bf16.mxu0 %v2630_v43 }
 0x108   : > { %1858 = vmatprep.subr.bf16.mxu1 %v2627_v42 }
 0x10a   : > { %1822 = vmatpush1.bf16.msra.mxu0 %v2628_v45 }
 0x10b   : > { %1859 = vmatpush1.bf16.msra.mxu1 %v2625_v44  ;;  %1823 = vmatprep.subr.bf16.mxu0 %v2636_v47 }
 0x10c   : > { %1860 = vmatprep.subr.bf16.mxu1 %v2633_v46 }
 0x10e   : > { %1824 = vmatpush1.bf16.msra.mxu0 %v2634_v49 }
 0x10f   : > { %1861 = vmatpush1.bf16.msra.mxu1 %v2631_v48  ;;  %1825 = vmatprep.subr.bf16.mxu0 %v2642_v51 }
 0x110   : > { %1862 = vmatprep.subr.bf16.mxu1 %v2639_v50 }
 0x112   : > { %1826 = vmatpush2.bf16.msra.mxu0 %v2640_v53  ;;  %v1934_v53 = vlaneseq }
 0x113   : > { %1863 = vmatpush1.bf16.msra.mxu1 %v2637_v52  ;;  %1827 = vmatprep.subr.bf16.mxu0 %v2648_v55 }
 0x114   : > { %1864 = vmatprep.subr.bf16.mxu1 %v2645_v54  ;;  %v1935_v55 = vshrl.u32 %v1934_v53, 7 }
 0x116   : > { %1828 = vmatpush2.bf16.msra.mxu0 %v2646_v57 }
 0x117   : > { %1865 = vmatpush1.bf16.msra.mxu1 %v2643_v56  ;;  %1829 = vmatprep.subr.bf16.mxu0 %v2654_v59  ;;  %v1936_v59 = vsub.s32 0, %v1935_v55 }
 0x118   : > { %1866 = vmatprep.subr.bf16.mxu1 %v2651_v58 }
 0x11a   : > { %1830 = vmatpush2.bf16.msra.mxu0 %v2652_v61  ;;  %v1932_v61 = vld [vmem:[%s3140_s4] sm:$0x3] }
 0x11b   : > { %1867 = vmatpush2.bf16.msra.mxu1 %v2649_v60  ;;  %1831 = vmatprep.subr.bf16.mxu0 %v2660_v63 }
 0x11c   : > { %1868 = vmatprep.subr.bf16.mxu1 %v2657_v62 }
 0x11e   : > { %1832 = vmatpush2.bf16.msra.mxu0 %v2658_v1 }
 0x11f   : > { %1869 = vmatpush2.bf16.msra.mxu1 %v2655_v0  ;;  %1833 = vmatprep.subr.bf16.mxu0 %v2666_v3  ;;  %v1940_v0 = vsub.s32 1, %v1935_v55 }
 0x120   : > { %1870 = vmatprep.subr.bf16.mxu1 %v2663_v2 }
 0x122   : > { %1834 = vmatpush2.bf16.msra.mxu0 %v2664_v5  ;;  %v1937_v5 = vrot.slane %v1932_v61, %v1936_v59 }
 0x123   : > { %1871 = vmatpush2.bf16.msra.mxu1 %v2661_v4  ;;  %1835 = vmatprep.subr.bf16.mxu0 %v2672_v7 }
 0x124   : > { %1872 = vmatprep.subr.bf16.mxu1 %v2669_v6 }
 0x126   : > { %1836 = vmatpush2.bf16.msra.mxu0 %v2670_v9 }
 0x127   : > { %1873 = vmatpush2.bf16.msra.mxu1 %v2667_v8  ;;  %1837 = vmatprep.subr.bf16.mxu0 %v2678_v11 }
 0x128   : > { %1874 = vmatprep.subr.bf16.mxu1 %v2675_v10  ;;  %v1941_v10 = vrot.slane %v1932_v61, %v1940_v0 }
 0x12a   : > { %1838 = vmatpush2.bf16.msra.mxu0 %v2676_v13 }
 0x12b   : > { %1875 = vmatpush2.bf16.msra.mxu1 %v2673_v12  ;;  %1839 = vmatprep.subr.bf16.mxu0 %v2684_v16 }
 0x12c   : > { %1876 = vmatprep.subr.bf16.mxu1 %v2681_v15 }
 0x12e   : > { %1840 = vmatpush2.bf16.msra.mxu0 %v2682_v19 }
 0x12f   : > { %1877 = vmatpush2.bf16.msra.mxu1 %v2679_v17  ;;  %1905 = vmatprep.subr.bf16.mxu0 %v2692_v21 }
 0x130   : > { %1878 = vmatprep.subr.bf16.mxu1 %v2689_v20 }
 0x131   : > { %1842 = vmatmul.mubr.bf16.vlgmr.msra.gmra.mxu0 %v2211_v22 }
 0x132   : > { %1906 = vmatpush1.bf16.msra.mxu0 %v2690_v24  ;;  %1923 = vmatprep.mubr.bf16.mxu0 %v2869_v14 }
 0x133   : > { %1879 = vmatpush2.bf16.msra.mxu1 %v2687_v23 }
 0x134   : > { %1880 = vmatprep.subr.bf16.mxu1 %v2695_v25 }
 0x137   : > { %1881 = vmatpush2.bf16.msra.mxu1 %v2693_v27 }
 0x139   : > { %2314 = vmatmul.mubr.msk.bf16.vlgmr.msra.gmra.mxu0 %vm1083_vm0, %v2698_v29  ;;  %v1958_v29 = vld [vmem:[%s3141_s5] sm:$0x3] }
 0x13a   : > { %1883 = vmatmul.mubr.bf16.vlgmr.msra.gmra.mxu1 %v2213_v28 }
 0x171   : > { %v1121_v18 = vpop.f32.mrf.mxu0 }
 0x172   : > { %v1162_v30 = vpop.f32.mrf.mxu1 }
 0x173   : > { %v1163_v31 = vadd.f32 %v1162_v30, %v1121_v18  ;;  %v1123_v32 = vpop.f32.mrf.mxu0 }
 0x174   : > { %v1164_v33 = vpop.f32.mrf.mxu1 }
 0x175   : > { %v1165_v34 = vadd.f32 %v1164_v33, %v1123_v32  ;;  %v1125_v35 = vpop.f32.mrf.mxu0  ;;  %v1967_v32 = vrot.slane %v1958_v29, %v1940_v0 }
 0x176   : > { %v1166_v36 = vpop.f32.mrf.mxu1 }
 0x177   : > { %v1126_v37 = vpop.f32.mrf.mxu0 }
 0x178   : > { %v1167_v38 = vpop.f32.mrf.mxu1 }
 0x179   : > { %v2315_v38 = vld [vmem:[#allocation2] ss:$0 sm:$0xff] }
 0x17a   : > { %v1244_v39 = vpop.f32.mrf.mxu1 }
 0x17c   : > { %v1246_v14 = vpop.f32.mrf.mxu1 }
 0x17e   : > { %v1248_v40 = vpop.f32.mrf.mxu1 }
 0x180   : > { %v1249_v41 = vpop.f32.mrf.mxu1 }
 0x1b1   : > { %v1203_v26 = vpop.f32.mrf.mxu0 }
 0x1b2   : > { %v1204_v42 = vadd.f32 %v1203_v26, %v1163_v31  ;;  %v1963_v31 = vrot.slane %v1958_v29, %v1936_v59 }
 0x1b3   : > { %v1205_v43 = vpop.f32.mrf.mxu0 }
 0x1b4   : > { %v1206_v44 = vadd.f32 %v1205_v43, %v1165_v34  ;;  %v1245_v45 = vadd.f32 %v1244_v39, %v1204_v42 }
 0x1b5   : > { %v1207_v46 = vpop.f32.mrf.mxu0 }
 0x1b6   : > { %v1247_v47 = vadd.f32 %v1246_v14, %v1206_v44 }
 0x1b7   : > { %v1208_v48 = vpop.f32.mrf.mxu0 }
 0x1ba   : > { %v1802_v49 = vpop.f32.mrf.mxu1 }
 0x1bb   : > { %v1803_v58 = vadd.f32 %v1802_v49, %v1245_v45 }
 0x1bc   : > { %v1804_v50 = vpop.f32.mrf.mxu1 }
 0x1bd   : > { %v1805_v62 = vadd.f32 %v1804_v50, %v1247_v47 }
 0x1be   : > { %v1806_v51 = vpop.f32.mrf.mxu1 }
 0x1c0   : > { %v1807_v52 = vpop.f32.mrf.mxu1 }
 0x1f1   : > { %v1843_v54 = vpop.f32.mrf.mxu0 }
 0x1f2   : > { %v1844_v63 = vadd.f32 %v1843_v54, %v1803_v58 }
 0x1f3   : > { %v1845_v56 = vpop.f32.mrf.mxu0 }
 0x1f4   : > { %v1846_v3 = vadd.f32 %v1845_v56, %v1805_v62 }
 0x1f5   : > { %v1847_v57 = vpop.f32.mrf.mxu0 }
 0x1f7   : > { %v1848_v60 = vpop.f32.mrf.mxu0 }
 0x1f9   : > { %v1925_v2 = vpop.f32.mrf.mxu0 }
 0x1fa   : > { %v1884_v1 = vpop.f32.mrf.mxu1 }
 0x1fb   : > { %v1885_v4 = vadd.f32 %v1884_v1, %v1844_v63  ;;  %v1927_v7 = vpop.f32.mrf.mxu0 }
 0x1fc   : > { %v1886_v6 = vpop.f32.mrf.mxu1 }
 0x1fd   : > { %v1926_v8 = vadd.f32 %v1925_v2, %v1885_v4  ;;  %v1887_v9 = vadd.f32 %v1886_v6, %v1846_v3  ;;  %v1929_v12 = vpop.f32.mrf.mxu0 }
 0x1fe   : > { %v1888_v11 = vpop.f32.mrf.mxu1 }
 0x1ff   : > { %v1944_v13 = vadd.f32 %v1937_v5, %v1926_v8  ;;  %v1928_v15 = vadd.f32 %v1927_v7, %v1887_v9  ;;  %v1930_v17 = vpop.f32.mrf.mxu0 }
 0x200   : > { %v1889_v16 = vpop.f32.mrf.mxu1 }
 0x201   : > { %v1946_v19 = vsub.f32 0.0, %v1944_v13  ;;  %v1945_v20 = vadd.f32 %v1941_v10, %v1928_v15 }
 0x203   : > { %v1948_v21 = vmul.f32 1.442695, %v1946_v19  ;;  %v1947_v22 = vsub.f32 0.0, %v1945_v20 }
 0x205   : > { %2699 = vpow2.f32 %v1948_v21  ;;  %v1950_v23 = vmul.f32 1.442695, %v1947_v22 }
 0x207   : > { %2701 = vpow2.f32 %v1950_v23 }
 0x212   : > { %v2700_v24 = vpop.eup %2699 }
 0x213   : > { %v1952_v25 = vadd.f32 1.0, %v2700_v24 }
 0x214   : > { %v2702_v27 = vpop.eup %2701 }
 0x215   : > { %2703 = vrcp.f32 %v1952_v25  ;;  %v1953_v28 = vadd.f32 1.0, %v2702_v27 }
 0x217   : > { %2705 = vrcp.f32 %v1953_v28 }
 0x222   : > { %v2704_v18 = vpop.eup %2703 }
 0x223   : > { %v1956_v30 = vmul.f32 %v2704_v18, %v1944_v13 }
 0x224   : > { %v2706_v33 = vpop.eup %2705 }
 0x225   : > { %v1957_v34 = vmul.f32 %v2706_v33, %v1945_v20  ;;  %v1970_v35 = vmul.f32 %v1963_v31, %v1956_v30 }
 0x227   : > { %v1971_v36 = vmul.f32 %v1967_v32, %v1957_v34 }
 0x229   : > { %v1972_v37 = vadd.f32 %v1971_v36, %v1970_v35 }
 0x22b   : > { %1973 = vadd.xlane.f32.xlu0 %v1972_v37 }
 0x2b4   : > { %v1974_v39 = vpop.xlane.xlu0 %1973 }
 0x2b5   : > { %v1982_v14 = vadd.f32 %v2315_v38, %v1974_v39 }
 0x2b7   : > { %1984 = vst.msk [vmem:[%s363_s16] sm:$0xff] %vm1983_vm1, %v1982_v14 }
 0x2b8 PF: > { %s3157_s29 = smov %s2986_s26  ;;  %p23_p13 = scmp.ge.s32.totalorder %s2975_s22, 4  }
 0x2b9   : > { %s3158_s26 = smov %s2853_s27  ;;  %s3159_s27 = smov %s2857_s28 }
 0x2ba   : > { %s3160_s28 = smov %s3157_s29  ;;  %s3161_s29 = smov %s2975_s22 }
 0x2bb   :  { %25 = sbr.rel (!%p23_p13) target bundleno = 9 (0x9), region = 109 }
 0x2c0   :  { %2004 = vsyncpa [#allocation4], 1 }
 0x2c1   :  { %2006 = vsyncpa [#allocation4 + $0x1], 1 }
 0x2c2   :  { %2007 = vsyncpa [#allocation6], 1 }
 0x2c3   :  { %2009 = vsyncpa [#allocation6 + $0x1], 1 }
 0x2c4   :  { %2010 = vsyncpa [#allocation9], 1 }

</bundles_post_ra>
